<compile_context>
chip_gen: v6e
topology: v6e:2x2x1
jax: 0.10.0
libtpu: 0.0.40
codegen_flags: <defaults>
</compile_context>

<pallas_src>
import functools

import jax
import jax.numpy as jnp
from jax.experimental import pallas as pl
from jax.experimental.pallas import tpu as pltpu


# --------------------------------------------------------------------------
# Kernel
# --------------------------------------------------------------------------
def _vq_kernel(z_ref, es_ref, et_ref, esq_ref, zq_ref, idx_ref, err_ref):
    """One (batch-block, token-tile) grid cell.

    z_ref   : (Bb, D, tn)  tokens on lanes, channels on sublanes
    es_ref  : (K, D)  -2 * embedding        (f32, grid-invariant, hoisted)
    et_ref  : (D, K)  embedding^T           (f32, grid-invariant, hoisted)
    esq_ref : (K, 1)  ||embedding||^2       (f32, grid-invariant, hoisted)
    zq_ref  : (Bb, D, tn);  idx_ref / err_ref : (Bb, 1, tn)
    """
    e_s = es_ref[...]
    e_t = et_ref[...]
    e_sq = esq_ref[...]
    K = e_s.shape[0]
    Bb = z_ref.shape[0]

    def one_batch(b):
        z = z_ref[b].astype(jnp.float32)                                 # (D, tn)

        # d_k - ||z||^2 = ||e_k||^2 - 2 e_k.z.  ||z||^2 is constant over k,
        # so dropping it leaves the argmin unchanged (err is computed from
        # z_q - z directly).  The -2 is already folded into e_s.
        cross = jnp.dot(e_s, z, preferred_element_type=jnp.float32)     # (K, tn) MXU
        d = e_sq + cross                                                 # (K, tn)

        # First-index argmin over the codebook axis (matches torch.argmin).
        # NOTE: if an entire distance column is NaN (degenerate input),
        # idx == K and the one-hot gather yields z_q == 0; torch.argmin
        # would pick some in-range index instead.  Harmless for sane inputs.
        min_d = jnp.min(d, axis=0, keepdims=True)                        # (1, tn)
        row = jax.lax.broadcasted_iota(jnp.int32, d.shape, 0)            # (K, tn)
        sel = jnp.where(d == min_d, row, K)                              # (K, tn)
        idx = jnp.min(sel, axis=0, keepdims=True)                        # (1, tn)
        idx_ref[b] = idx.astype(jnp.int32)

        # Gather codebook vectors with a one-hot matmul; reuse `sel` so `row`
        # dies early (one fewer live (K,tn) temporary -> less vreg pressure).
        one_hot = (sel == idx).astype(jnp.float32)                       # (K, tn)
        z_q = jnp.dot(e_t, one_hot, preferred_element_type=jnp.float32)  # (D, tn) MXU
        zq_ref[b] = z_q.astype(zq_ref.dtype)

        # Per-token squared error (summed over D) for the loss.
        diff = z_q - z
        err_ref[b] = jnp.sum(diff * diff, axis=0, keepdims=True)         # (1, tn)

    if Bb == 1:
        one_batch(0)
    else:
        # Multi-batch block: unrolled in-kernel loop (fattens per-step work on
        # single-TC v5e/v6e where the grid is a serial loop).
        def body(b, carry):
            one_batch(b)
            return carry

        jax.lax.fori_loop(0, Bb, body, 0, unroll=True)


# --------------------------------------------------------------------------
# Tiling / spec helpers
# --------------------------------------------------------------------------
def _largest_divisor(n, limit, multiple_of=1):
    """Largest divisor of n that is <= limit and a multiple of `multiple_of`."""
    best = 0
    d = 1
    while d * d <= n:
        if n % d == 0:
            for c in (d, n // d):
                if c <= limit and c % multiple_of == 0:
                    best = max(best, c)
        d += 1
    return best


def _choose_tiling(B, D, K, HW):
    """Pick (batch rows per step Bb, token-tile width tile_n).

    Budget: ~4 live (K, tile_n) f32 temporaries (d / sel / one_hot / z_q-ish)
    plus double-buffered z / z_q / idx / err blocks must fit a conservative
    scoped-VMEM budget (works under v5e's 16 MiB default and leaves headroom
    on v7x's 64 MiB physical VMEM).
    """
    per_token = 4 * K * 4 + (2 * 2 * D + 8) * 4
    budget = 24 * 1024 * 1024
    target = max(128, min(budget // per_token, 8192))

    # Token tile: largest lane-aligned (multiple of 128) divisor of HW under
    # the budget; fall back to the full row (full-dim blocks are always legal).
    tile_n = _largest_divisor(HW, target, multiple_of=128)
    if tile_n == 0:
        tile_n = HW
    num_tiles = HW // tile_n

    # Batch rows per grid step: fatten per-step work toward `target` tokens
    # (grid steps cost ~600 cycles of overhead on single-TC v5e/v6e).
    Bb = 1
    for cand in range(1, B + 1):
        if B % cand == 0 and cand * tile_n <= target:
            Bb = cand

    # v7x has 2 TensorCores: keep >= 2 parallel grid cells when possible.
    while Bb > 1 and (B // Bb) * num_tiles < 2:
        Bb -= 1
        while Bb > 1 and B % Bb != 0:
            Bb -= 1
    if (B // Bb) * num_tiles < 2 and HW > 128:
        half = _largest_divisor(HW, HW // 2, multiple_of=128)
        if half >= 128:
            tile_n = half
            num_tiles = HW // tile_n

    return Bb, tile_n


_SINGLE_BUFFER_THRESHOLD_BYTES = 256 * 1024


def _invariant_spec(block_shape, nbytes):
    """BlockSpec for a grid-invariant input; single-buffered when large."""
    index_map = lambda gb, t: (0,) * len(block_shape)
    if nbytes >= _SINGLE_BUFFER_THRESHOLD_BYTES and hasattr(pl, "Buffered"):
        try:
            # Never changes across the grid -> second pipeline buffer is waste.
            return pl.BlockSpec(block_shape, index_map,
                                pipeline_mode=pl.Buffered(1))
        except TypeError:
            pass
    return pl.BlockSpec(block_shape, index_map)


# --------------------------------------------------------------------------
# Wrapper
# --------------------------------------------------------------------------
@functools.partial(jax.jit, static_argnames=("beta",))
def codebook_forward(z, embedding, *, beta=0.25):
    """z: (B, C, H, W) with C == latent_dim; embedding: (K, latent_dim)."""
    B, C, H, W = z.shape
    D = C
    K = embedding.shape[0]
    HW = H * W

    Bb, tile_n = _choose_tiling(B, D, K, HW)
    grid = (B // Bb, HW // tile_n)

    # Channel-major token layout: NCHW -> (B, D, H*W). No transposes needed.
    z3 = z.reshape(B, D, HW)

    # Hoist grid-invariant codebook work out of the grid loop (f32).
    e_f32 = embedding.astype(jnp.float32)
    e_scaled = -2.0 * e_f32                                              # (K, D)
    e_t = e_f32.T                                                        # (D, K)
    e_sq = jnp.sum(e_f32 * e_f32, axis=1, keepdims=True)                 # (K, 1)

    # Scoped-VMEM sizing: double-buffered blocks + codebook + live temps.
    blk_bytes = Bb * tile_n * (2 * D + 2) * 4
    code_bytes = (2 * K * D + K) * 4
    temp_bytes = 4 * K * tile_n * 4
    vmem_limit = int(min(48 << 20,
                         max(32 << 20,
                             2 * blk_bytes + 2 * code_bytes + temp_bytes
                             + (4 << 20))))

    zq3, idx3, err3 = pl.pallas_call(
        _vq_kernel,
        out_shape=(
            jax.ShapeDtypeStruct((B, D, HW), z.dtype),       # z_q (channel-major)
            jax.ShapeDtypeStruct((B, 1, HW), jnp.int32),     # indices (lane-dense)
            jax.ShapeDtypeStruct((B, 1, HW), jnp.float32),   # per-token SSE
        ),
        grid_spec=pltpu.PrefetchScalarGridSpec(
            num_scalar_prefetch=0,
            grid=grid,
            in_specs=[
                pl.BlockSpec((Bb, D, tile_n), lambda gb, t: (gb, 0, t)),  # z tile
                _invariant_spec((K, D), K * D * 4),                       # -2*e
                _invariant_spec((D, K), K * D * 4),                       # e^T
                _invariant_spec((K, 1), K * 4),                           # ||e||^2
            ],
            out_specs=[
                pl.BlockSpec((Bb, D, tile_n), lambda gb, t: (gb, 0, t)),
                pl.BlockSpec((Bb, 1, tile_n), lambda gb, t: (gb, 0, t)),
                pl.BlockSpec((Bb, 1, tile_n), lambda gb, t: (gb, 0, t)),
            ],
        ),
        compiler_params=pltpu.CompilerParams(
            dimension_semantics=("parallel", "parallel"),
            vmem_limit_bytes=vmem_limit),
    )(z3, e_scaled, e_t, e_sq)

    # (B, 1, HW) -> (B*H*W,) in (b, h, w) order, matching the PyTorch flatten.
    min_encoding_indices = idx3.reshape(-1)

    # loss = mean((zq.detach()-z)^2) + beta*mean((zq-z.detach())^2)
    # forward value = (1 + beta) * mean((z_q - z)^2)
    loss = (1.0 + beta) * (jnp.sum(err3) / (B * HW * D))

    # Straight-through estimator z_q = z + (z_q - z).detach(): forward == z_q.
    # zq3 is already channel-major, so NCHW is a free reshape.
    z_q = zq3.reshape(B, D, H, W)
    return z_q, min_encoding_indices, loss


# --------------------------------------------------------------------------
# Pure-JAX reference (mirrors the PyTorch forward)
# --------------------------------------------------------------------------
def _reference_forward(z, embedding, beta):
    B, C, H, W = z.shape
    z_nhwc = jnp.transpose(z, (0, 2, 3, 1))
    zf = z_nhwc.reshape(-1, C)
    d = (jnp.sum(zf ** 2, axis=1, keepdims=True)
         + jnp.sum(embedding ** 2, axis=1)
         - 2.0 * jnp.matmul(zf, embedding.T,
                            precision=jax.lax.Precision.HIGHEST))
    idx = jnp.argmin(d, axis=1)
    zq = embedding[idx].reshape(z_nhwc.shape)
    loss = (1.0 + beta) * jnp.mean((zq - z_nhwc) ** 2)
    zq = jnp.transpose(zq, (0, 3, 1, 2))
    return zq, idx.astype(jnp.int32), loss


if __name__ == "__main__":
    # configs = {'num_codebook_vectors': 64, 'latent_dim': 16, 'beta': 0.25}
    num_codebook_vectors = 64
    latent_dim = 16
    beta = 0.25

    key = jax.random.PRNGKey(0)
    k_z, k_e = jax.random.split(key)

    # z: (B, latent_dim, H, W) — NCHW like the PyTorch module expects
    B, H, W = 2, 16, 16
    z = jax.random.normal(k_z, (B, latent_dim, H, W), dtype=jnp.float32)

    # nn.Embedding weight, uniform(-1/K, 1/K) like the module's __init__
    embedding = jax.random.uniform(
        k_e, (num_codebook_vectors, latent_dim), dtype=jnp.float32,
        minval=-1.0 / num_codebook_vectors, maxval=1.0 / num_codebook_vectors)

    z_q, indices, loss = codebook_forward(z, embedding, beta=beta)
    jax.block_until_ready((z_q, indices, loss))

    # Sanity check against pure-JAX reference
    zq_ref, idx_ref, loss_ref = _reference_forward(z, embedding, beta)
    assert z_q.shape == (B, latent_dim, H, W)
    assert indices.shape == (B * H * W,)
    assert jnp.allclose(z_q, zq_ref, atol=1e-5), "z_q mismatch"
    assert jnp.all(indices == idx_ref), "indices mismatch"
    assert jnp.allclose(loss, loss_ref, atol=1e-5, rtol=1e-5), "loss mismatch"

    print("KERNEL_OK")
</pallas_src>

<mosaic_0001>
module attributes {stable_mosaic.version = 11 : i64} {
  func.func @_vq_kernel(%arg0: i32, %arg1: i32, %arg2: memref<1x16x256xf32, #tpu.memory_space<vmem>>, %arg3: memref<64x16xf32, #tpu.memory_space<vmem>>, %arg4: memref<16x64xf32, #tpu.memory_space<vmem>>, %arg5: memref<64x1xf32, #tpu.memory_space<vmem>>, %arg6: memref<1x16x256xf32, #tpu.memory_space<vmem>>, %arg7: memref<1x1x256xi32, #tpu.memory_space<vmem>>, %arg8: memref<1x1x256xf32, #tpu.memory_space<vmem>>) attributes {dimension_semantics = [#tpu.dimension_semantics<parallel>, #tpu.dimension_semantics<parallel>], iteration_bounds = array<i64: 2, 1>, scalar_prefetch = 0 : i64, scratch_operands = 0 : i64, tpu.core_type = #tpu.core_type<tc>, window_params = [{transform_indices = @transform_0, window_bounds = array<i64: 1, 16, 256>}, {pipeline_mode = #tpu.pipeline_mode<synchronous>, transform_indices = @transform_1, window_bounds = array<i64: 64, 16>}, {pipeline_mode = #tpu.pipeline_mode<synchronous>, transform_indices = @transform_2, window_bounds = array<i64: 16, 64>}, {pipeline_mode = #tpu.pipeline_mode<synchronous>, transform_indices = @transform_3, window_bounds = array<i64: 64, 1>}, {transform_indices = @transform_4, window_bounds = array<i64: 1, 16, 256>}, {transform_indices = @transform_5, window_bounds = array<i64: 1, 1, 256>}, {transform_indices = @transform_6, window_bounds = array<i64: 1, 1, 256>}]} {
    %c0 = arith.constant 0 : index
    %c0_0 = arith.constant 0 : index
    %0 = vector.load %arg3[%c0, %c0_0] : memref<64x16xf32, #tpu.memory_space<vmem>>, vector<64x16xf32>
    %c0_1 = arith.constant 0 : index
    %c0_2 = arith.constant 0 : index
    %1 = vector.load %arg4[%c0_1, %c0_2] : memref<16x64xf32, #tpu.memory_space<vmem>>, vector<16x64xf32>
    %c0_3 = arith.constant 0 : index
    %c0_4 = arith.constant 0 : index
    %2 = vector.load %arg5[%c0_3, %c0_4] : memref<64x1xf32, #tpu.memory_space<vmem>>, vector<64x1xf32>
    %c0_5 = arith.constant 0 : index
    %c0_6 = arith.constant 0 : index
    %c0_7 = arith.constant 0 : index
    %3 = vector.load %arg2[%c0_5, %c0_6, %c0_7] : memref<1x16x256xf32, #tpu.memory_space<vmem>>, vector<1x16x256xf32>
    %4 = vector.shape_cast %3 : vector<1x16x256xf32> to vector<16x256xf32>
    %cst = arith.constant dense<0.000000e+00> : vector<64x256xf32>
    %5 = tpu.matmul %0, %4, %cst {dimension_numbers = #tpu.dot_dimension_numbers<[1], [0], [0], [1], [0, 0, 1, 1], [], []>} : vector<64x16xf32>, vector<16x256xf32>, vector<64x256xf32> -> vector<64x256xf32>
    %6 = vector.broadcast %2 : vector<64x1xf32> to vector<64x256xf32>
    %7 = arith.addf %6, %5 : vector<64x256xf32>
    %cst_8 = arith.constant dense<0x7F800000> : vector<256xf32>
    %8 = vector.multi_reduction <minimumf>, %7, %cst_8 [0] : vector<64x256xf32> to vector<256xf32>
    %9 = vector.shape_cast %8 : vector<256xf32> to vector<1x256xf32>
    %10 = tpu.iota {dimensions = array<i32: 0>} : vector<64x256xi32>
    %11 = vector.broadcast %9 : vector<1x256xf32> to vector<64x256xf32>
    %12 = arith.cmpf oeq, %7, %11 : vector<64x256xf32>
    %c64_i32 = arith.constant 64 : i32
    %13 = vector.broadcast %c64_i32 : i32 to vector<64x256xi32>
    %14 = arith.select %12, %10, %13 : vector<64x256xi1>, vector<64x256xi32>
    %cst_9 = arith.constant dense<2147483647> : vector<256xi32>
    %15 = vector.multi_reduction <minsi>, %14, %cst_9 [0] : vector<64x256xi32> to vector<256xi32>
    %16 = vector.shape_cast %15 : vector<256xi32> to vector<1x256xi32>
    %c0_10 = arith.constant 0 : index
    %c0_11 = arith.constant 0 : index
    %c0_12 = arith.constant 0 : index
    %17 = vector.load %arg7[%c0_10, %c0_11, %c0_12] : memref<1x1x256xi32, #tpu.memory_space<vmem>>, vector<1x1x256xi32>
    %18 = vector.shape_cast %17 : vector<1x1x256xi32> to vector<1x256xi32>
    %19 = vector.shape_cast %16 : vector<1x256xi32> to vector<1x1x256xi32>
    tpu.vector_store %arg7[%c0_10, %c0_11, %c0_12], %19 {strides = array<i32>} : memref<1x1x256xi32, #tpu.memory_space<vmem>>, vector<1x1x256xi32>,
    %20 = vector.broadcast %16 : vector<1x256xi32> to vector<64x256xi32>
    %21 = arith.cmpi eq, %14, %20 : vector<64x256xi32>
    %22 = arith.extui %21 : vector<64x256xi1> to vector<64x256xi32>
    %23 = arith.sitofp %22 : vector<64x256xi32> to vector<64x256xf32>
    %cst_13 = arith.constant dense<0.000000e+00> : vector<16x256xf32>
    %24 = tpu.matmul %1, %23, %cst_13 {dimension_numbers = #tpu.dot_dimension_numbers<[1], [0], [0], [1], [0, 0, 1, 1], [], []>} : vector<16x64xf32>, vector<64x256xf32>, vector<16x256xf32> -> vector<16x256xf32>
    %c0_14 = arith.constant 0 : index
    %c0_15 = arith.constant 0 : index
    %c0_16 = arith.constant 0 : index
    %25 = vector.load %arg6[%c0_14, %c0_15, %c0_16] : memref<1x16x256xf32, #tpu.memory_space<vmem>>, vector<1x16x256xf32>
    %26 = vector.shape_cast %25 : vector<1x16x256xf32> to vector<16x256xf32>
    %27 = vector.shape_cast %24 : vector<16x256xf32> to vector<1x16x256xf32>
    tpu.vector_store %arg6[%c0_14, %c0_15, %c0_16], %27 {strides = array<i32>} : memref<1x16x256xf32, #tpu.memory_space<vmem>>, vector<1x16x256xf32>,
    %28 = arith.subf %24, %4 : vector<16x256xf32>
    %29 = arith.mulf %28, %28 : vector<16x256xf32>
    %cst_17 = arith.constant dense<0.000000e+00> : vector<256xf32>
    %30 = vector.multi_reduction <add>, %29, %cst_17 [0] : vector<16x256xf32> to vector<256xf32>
    %31 = vector.shape_cast %30 : vector<256xf32> to vector<1x256xf32>
    %c0_18 = arith.constant 0 : index
    %c0_19 = arith.constant 0 : index
    %c0_20 = arith.constant 0 : index
    %32 = vector.load %arg8[%c0_18, %c0_19, %c0_20] : memref<1x1x256xf32, #tpu.memory_space<vmem>>, vector<1x1x256xf32>
    %33 = vector.shape_cast %32 : vector<1x1x256xf32> to vector<1x256xf32>
    %34 = vector.shape_cast %31 : vector<1x256xf32> to vector<1x1x256xf32>
    tpu.vector_store %arg8[%c0_18, %c0_19, %c0_20], %34 {strides = array<i32>} : memref<1x1x256xf32, #tpu.memory_space<vmem>>, vector<1x1x256xf32>,
    return
  }
  func.func @transform_0(%arg0: i32, %arg1: i32) -> (i32, i32, i32) {
    %c0_i32 = arith.constant 0 : i32
    %c0_i32_0 = arith.constant 0 : i32
    return %arg0, %c0_i32, %arg1 : i32, i32, i32
  }
  func.func @transform_1(%arg0: i32, %arg1: i32) -> (i32, i32) {
    %c0_i32 = arith.constant 0 : i32
    %c0_i32_0 = arith.constant 0 : i32
    %c0_i32_1 = arith.constant 0 : i32
    return %c0_i32, %c0_i32_0 : i32, i32
  }
  func.func @transform_2(%arg0: i32, %arg1: i32) -> (i32, i32) {
    %c0_i32 = arith.constant 0 : i32
    %c0_i32_0 = arith.constant 0 : i32
    %c0_i32_1 = arith.constant 0 : i32
    return %c0_i32, %c0_i32_0 : i32, i32
  }
  func.func @transform_3(%arg0: i32, %arg1: i32) -> (i32, i32) {
    %c0_i32 = arith.constant 0 : i32
    %c0_i32_0 = arith.constant 0 : i32
    %c0_i32_1 = arith.constant 0 : i32
    return %c0_i32, %c0_i32_0 : i32, i32
  }
  func.func @transform_4(%arg0: i32, %arg1: i32) -> (i32, i32, i32) {
    %c0_i32 = arith.constant 0 : i32
    %c0_i32_0 = arith.constant 0 : i32
    return %arg0, %c0_i32, %arg1 : i32, i32, i32
  }
  func.func @transform_5(%arg0: i32, %arg1: i32) -> (i32, i32, i32) {
    %c0_i32 = arith.constant 0 : i32
    %c0_i32_0 = arith.constant 0 : i32
    return %arg0, %c0_i32, %arg1 : i32, i32, i32
  }
  func.func @transform_6(%arg0: i32, %arg1: i32) -> (i32, i32, i32) {
    %c0_i32 = arith.constant 0 : i32
    %c0_i32_0 = arith.constant 0 : i32
    return %arg0, %c0_i32, %arg1 : i32, i32, i32
  }
}

</mosaic_0001>

<bundles_post_ra>
// kernel: codebook_forward.1
= control target key start
LH: loop header
LB: loop body
LE: loop exit
PB: predicated region body
PF: predicated region fallthrough
CT: control target
= control target key end

     0   :  { %12 = vsyncpa [#allocation3], 0  ;;  %s1619_s0 = inlined_call_operand.vmem [shape: f32[2,16,256], index: 0, kind: input, shape index: {}]   ;;  %s1620_s1 = inlined_call_operand.vmem [shape: f32[64,16], index: 1, kind: input, shape index: {}]   ;;  %s1621_s2 = inlined_call_operand.vmem [shape: f32[16,64], index: 2, kind: input, shape index: {}]   ;;  %s1622_s3 = inlined_call_operand.vmem [shape: f32[64,1], index: 3, kind: input, shape index: {}]   ;;  %s1623_s4 = inlined_call_operand.vmem [shape: f32[2,16,256], index: 4, kind: output, shape index: {0}]   ;;  %s1624_s5 = inlined_call_operand.hbm [shape: s32[2,1,256], index: 5, kind: output, shape index: {1}]   ;;  %s1625_s6 = inlined_call_operand.vmem [shape: f32[2,1,256], index: 6, kind: output, shape index: {2}]  }
   0x1   :  { %14 = vsyncpa [#allocation3 + $0x1], 0  ;;  %s1279_s21 = smov 0   ;;  %s1281_s22 = smov 0  }
   0x2   :  { %s1283_s23 = smov 0   ;;  %s1285_s24 = smov 0  }
   0x3   :  { %s1287_s25 = smov 0   ;;  %s1289_s26 = smov 0  }
   0x4 LB: > { %s1039_s27 = sadd.s32 4294967295, %s1237_s26   ;;  %s1040_s28 = sadd.s32 4294967294, %s1237_s26   ;;  %s1237_s26 = sphi %s1289_s26, %s20_s26   ;;  %s1233_s25 = sphi %s1287_s25, %s1636_s25   ;;  %s1229_s24 = sphi %s1285_s24, %s1635_s24   ;;  %s1225_s23 = sphi %s1283_s23, %s1634_s23   ;;  %s1221_s22 = sphi %s1281_s22, %s1633_s22   ;;  %s1217_s21 = sphi %s1279_s21, %s1632_s21  }
   0x5   : > { %s32_s29 = sadd.s32 1, %s1233_s25  ;;  %s160_s30 = sadd.s32 1, %s1225_s23 }
   0x6   : > { %p34_p0 = scmp.ge.s32.totalorder %s32_s29, 2  ;;  %p170_p1 = scmp.ne.s32.totalorder %s1225_s23, %s1221_s22 }
   0x7   : > { %p171_p2 = scmp.eq.s32.totalorder %s1039_s27, 1  ;;  %p176_p3 = scmp.ne.s32.totalorder %s1221_s22, %s1217_s21 }
   0x8   : > { %s1638_s29 = smov (%p34_p0, %s32_s29), 0  ;;  %p177_p5 = scmp.eq.s32.totalorder %s1040_s28, 1 }
   0x9   : > { %p1319_p4 = por %p171_p2, %p170_p1  ;;  %s155_s8 = ssub.s32 %s1233_s25, %s1638_s29 }
   0xa   : > { %p1043_p6 = scmp.ge.s32.totalorder %s1237_s26, 1  ;;  %p158_p7 = scmp.eq.s32.totalorder %s155_s8, 0 }
   0xb   : > { %p1326_p8 = por %p177_p5, %p176_p3  ;;  %p245_p9 = scmp.lt.s32.totalorder %s1237_s26, 3 }
   0xc   : > { %s1332_s10 = scalar_select %p158_p7, %s1225_s23, %s160_s30  }
   0xd   : > { %p246_p10 = pnand %p1043_p6, %p245_p9 }
   0xe   : > { %p297_p11 = scmp.lt.s32.totalorder (!%p246_p10), %s1229_s24, 1  ;;  %s283_s8 = sand.u32 (!%p246_p10), 1, %s1221_s22  }
   0xf   : > { %249 = sbr.rel (%p246_p10) target bundleno = 541 (0x21d), region = 36  ;;  %s1532_s12 = sshll.u32 (!%p246_p10), %s283_s8, 1 }
  0x10   : > { %s285_s13 = scalar_lea.vmem (!%p246_p10), [#allocation2], %s1532_s12  ;;  %s1099_s19 = sshll.u32 (!%p246_p10), %s1229_s24, 5 }
  0x11   : > { %s888_s28 = scalar_lea.hbm (!%p246_p10), %s1624_s5, %s1099_s19  ;;  %s890_s30 = sshll.u32 (!%p246_p10), %s285_s13, 4  ;;  %s891_s30 = int_to_ptr.vmem [resolvable:$true] %s890_s30 }
  0x12   : > { %s862_s12 = scalar_lea.sflag (!%p246_p10), [#allocation3], %s283_s8  ;;  %s1161_s14 = scalar_lea.vmem (!%p246_p10), %s891_s30, 32 }
  0x13   : > { %p1162_p12 = scmp.ne.s32.totalorder (!%p246_p10), %s891_s30, %s1161_s14  ;;  %s1243_s15 = smov (!%p246_p10), [#allocation2]  }
  0x14   : > { %v1239_v0 = vmov 0.0   ;;  %s1338_s11 = scalar_select %p297_p11, %s1229_s24, 1  ;;  %v1240_v1 = vmov 0   ;;  %v336_v2 = vld [vmem:[%s1622_s3] sm:$0xff]  ;;  %v338_v3 = vld [vmem:[%s1622_s3 + $0x10] sm:$0xff]  ;;  %v337_v4 = vld [vmem:[%s1622_s3 + $0x8] sm:$0xff] }
  0x15   : > { %437 = vmatprep.mubr.f32.mxu0 %v1239_v0  ;;  %794 = vmatprep.mubr.f32.mxu1 %v1239_v0  ;;  %v339_v5 = vld [vmem:[%s1622_s3 + $0x18] sm:$0xff]  ;;  %v326_v10 = vld [vmem:[%s1620_s1] sm:$0xff]  ;;  %vm348_vm0 = vcmask 130048   ;;  %v341_v12 = vld [vmem:[%s1622_s3 + $0x28] sm:$0xff]  ;;  %p1163_p13 = pnand %p1162_p12, %p1319_p4 }
  0x16   : > { %1159 = vset.pattern.permute.xlu0 %v1240_v1  ;;  %1160 = vset.pattern.permute.xlu1 %v1240_v1  ;;  %s1626_s16 = sshll.u32 %s1338_s11, 5  ;;  %v340_v11 = vld [vmem:[%s1622_s3 + $0x20] sm:$0xff]  ;;  %v327_v13 = vld [vmem:[%s1620_s1 + $0x8] sm:$0xff]  ;;  %v342_v14 = vld [vmem:[%s1622_s3 + $0x30] sm:$0xff] }
  0x17   : > { %488 = vperm.xlu0 %1159, %v336_v2   ;;  %498 = vperm.xlu1 %1160, %v338_v3   ;;  %s304_s27 = scalar_lea.vmem %s1619_s0, %s1626_s16  ;;  %v343_v15 = vld [vmem:[%s1622_s3 + $0x38] sm:$0xff]  ;;  %v328_v16 = vld [vmem:[%s1620_s1 + $0x10] sm:$0xff]  ;;  %v330_v18 = vld [vmem:[%s1620_s1 + $0x20] sm:$0xff]  ;;  %p1164_p0 = pneg %p1163_p13 }
  0x18   : > { %v1358_v6 = vld [vmem:[%s304_s27 + $0x18] sm:$0xff]  ;;  %v1360_v7 = vld [vmem:[%s304_s27 + $0x10] sm:$0xff]  ;;  %v1362_v8 = vld [vmem:[%s304_s27 + $0x8] sm:$0xff]  ;;  %s1165_s16 = sshll.u32 %s1243_s15, 4  ;;  %s1166_s16 = int_to_ptr.vmem [resolvable:$false] %s1165_s16 }
  0x19   : > { %401 = vmatprep.subr.mxu0 %v1358_v6  ;;  %v1365_v9 = vld [vmem:[%s304_s27] sm:$0xff]  ;;  %v329_v17 = vld [vmem:[%s1620_s1 + $0x18] sm:$0xff]  ;;  %v331_v19 = vld [vmem:[%s1620_s1 + $0x28] sm:$0xff]  ;;  %s1167_s17 = scalar_lea.vmem %s1166_s16, 64  ;;  %p1168_p1 = scmp.lt.s32.totalorder %s891_s30, %s1166_s16 }
  0x1a   : > { %402 = vmatpush1.msra.mxu0 %v1360_v7  ;;  %v332_v20 = vld [vmem:[%s1620_s1 + $0x30] sm:$0xff]  ;;  %v333_v21 = vld [vmem:[%s1620_s1 + $0x38] sm:$0xff]  ;;  %p1169_p2 = scmp.lt.s32.totalorder %s1167_s17, %s1161_s14 }
  0x1b   : > { %493 = vperm.xlu0 %1159, %v337_v4   ;;  %503 = vperm.xlu1 %1160, %v339_v5  }
  0x1c   : > { %403 = vmatprep.subr.mxu0 %v1362_v8  ;;  %p1170_p3 = por %p1169_p2, %p1168_p1 }
  0x1d   : > { %404 = vmatpush1.msra.mxu0 %v1365_v9 }
  0x1e   : > { %1050 = vmatmul.mubr.msk.f32.vlgmr.msra.gmra.mxu0 %vm348_vm0, %v326_v10  ;;  %p1171_p5 = pnand %p1170_p3, %p1164_p0 }
  0x1f   : > { %508 = vperm.xlu0 %1159, %v340_v11   ;;  %443 = vmatprep.mubr.f32.mxu0 %v1239_v0 }
  0x20   : > { %513 = vperm.xlu1 %1160, %v341_v12  }
  0x22   : > { %1051 = vmatmul.mubr.msk.f32.gmra.mxu0 %vm348_vm0, %v327_v13 }
  0x23   : > { %518 = vperm.xlu0 %1159, %v342_v14   ;;  %449 = vmatprep.mubr.f32.mxu0 %v1239_v0 }
  0x24   : > { %523 = vperm.xlu1 %1160, %v343_v15  }
  0x26   : > { %1052 = vmatmul.mubr.msk.f32.gmra.mxu0 %vm348_vm0, %v328_v16 }
  0x27   : > { %455 = vmatprep.mubr.f32.mxu0 %v1239_v0 }
  0x2a   : > { %1053 = vmatmul.mubr.msk.f32.gmra.mxu0 %vm348_vm0, %v329_v17 }
  0x2b   : > { %461 = vmatprep.mubr.f32.mxu0 %v1239_v0 }
  0x2e   : > { %1054 = vmatmul.mubr.msk.f32.gmra.mxu0 %vm348_vm0, %v330_v18 }
  0x2f   : > { %467 = vmatprep.mubr.f32.mxu0 %v1239_v0 }
  0x32   : > { %1055 = vmatmul.mubr.msk.f32.gmra.mxu0 %vm348_vm0, %v331_v19  ;;  %v568_v19 = vlaneseq }
  0x33   : > { %473 = vmatprep.mubr.f32.mxu0 %v1239_v0 }
  0x36   : > { %1056 = vmatmul.mubr.msk.f32.gmra.mxu0 %vm348_vm0, %v332_v20 }
  0x37   : > { %479 = vmatprep.mubr.f32.mxu0 %v1239_v0 }
  0x3a   : > { %1057 = vmatmul.mubr.msk.f32.gmra.mxu0 %vm348_vm0, %v333_v21 }
  0x92   : > { %v489_v27 = vpop.permute.xlu0 %488  ;;  %v499_v28 = vpop.permute.xlu1 %498 }
  0x96   : > { %v494_v32 = vpop.permute.xlu0 %493  ;;  %v504_v33 = vpop.permute.xlu1 %503 }
  0x9a   : > { %v509_v36 = vpop.permute.xlu0 %508 }
  0x9b   : > { %v514_v38 = vpop.permute.xlu1 %513 }
  0x9e   : > { %v519_v51 = vpop.permute.xlu0 %518 }
  0x9f   : > { %v524_v60 = vpop.permute.xlu1 %523 }
  0xde   : > { %v439_v22 = vpop.f32.mrf.mxu0 }
  0xdf   : > { %v526_v45 = vadd.f32 %v489_v27, %v439_v22 }
  0xe0   : > { %v441_v23 = vpop.f32.mrf.mxu0 }
  0xe1   : > { %v1431_v49 = vadd.f32 %v489_v27, %v441_v23 }
  0xe2   : > { %v445_v24 = vpop.f32.mrf.mxu0 }
  0xe3   : > { %v528_v46 = vadd.f32 %v494_v32, %v445_v24  ;;  %v1455_v24 = vshrl.u32 %v568_v19, 7 }
  0xe4   : > { %v447_v25 = vpop.f32.mrf.mxu0 }
  0xe5   : > { %v1433_v50 = vadd.f32 %v494_v32, %v447_v25  ;;  %v573_v32 = vadd.s32 32, %v1455_v24 }
  0xe6   : > { %v451_v26 = vpop.f32.mrf.mxu0 }
  0xe7   : > { %v1421_v40 = vadd.f32 %v499_v28, %v451_v26 }
  0xe8   : > { %v453_v29 = vpop.f32.mrf.mxu0 }
  0xe9   : > { %v1425_v42 = vadd.f32 %v499_v28, %v453_v29  ;;  %v542_v54 = vmin.f32 %v526_v45, %v1421_v40  ;;  %v570_v29 = vadd.s32 8, %v1455_v24 }
  0xea   : > { %v457_v30 = vpop.f32.mrf.mxu0 }
  0xeb   : > { %v1423_v41 = vadd.f32 %v504_v33, %v457_v30  ;;  %v555_v58 = vmin.f32 %v1431_v49, %v1425_v42  ;;  %v571_v30 = vadd.s32 16, %v1455_v24 }
  0xec   : > { %v459_v31 = vpop.f32.mrf.mxu0 }
  0xed   : > { %v1427_v43 = vadd.f32 %v504_v33, %v459_v31  ;;  %v543_v55 = vmin.f32 %v528_v46, %v1423_v41  ;;  %v572_v31 = vadd.s32 24, %v1455_v24  ;;  %v574_v33 = vadd.s32 40, %v1455_v24 }
  0xee   : > { %v463_v34 = vpop.f32.mrf.mxu0 }
  0xef   : > { %v534_v47 = vadd.f32 %v509_v36, %v463_v34  ;;  %v556_v59 = vmin.f32 %v1433_v50, %v1427_v43  ;;  %v575_v34 = vadd.s32 48, %v1455_v24 }
  0xf0   : > { %v465_v35 = vpop.f32.mrf.mxu0 }
  0xf1   : > { %v1435_v52 = vadd.f32 %v509_v36, %v465_v35  ;;  %v544_v62 = vmin.f32 %v542_v54, %v534_v47  ;;  %v576_v36 = vadd.s32 56, %v1455_v24 }
  0xf2   : > { %v469_v37 = vpop.f32.mrf.mxu0 }
  0xf3   : > { %v1429_v48 = vadd.f32 %v514_v38, %v469_v37  ;;  %v557_v3 = vmin.f32 %v555_v58, %v1435_v52 }
  0xf4   : > { %v471_v39 = vpop.f32.mrf.mxu0 }
  0xf5   : > { %v1439_v56 = vadd.f32 %v514_v38, %v471_v39  ;;  %v545_v63 = vmin.f32 %v543_v55, %v1429_v48 }
  0xf6   : > { %v475_v44 = vpop.f32.mrf.mxu0 }
  0xf7   : > { %v538_v57 = vadd.f32 %v519_v51, %v475_v44  ;;  %v558_v5 = vmin.f32 %v556_v59, %v1439_v56 }
  0xf8   : > { %v477_v53 = vpop.f32.mrf.mxu0 }
  0xf9   : > { %v1446_v1 = vadd.f32 %v519_v51, %v477_v53  ;;  %v546_v10 = vmin.f32 %v544_v62, %v538_v57 }
  0xfa   : > { %v481_v61 = vpop.f32.mrf.mxu0 }
  0xfb   : > { %v540_v2 = vadd.f32 %v524_v60, %v481_v61  ;;  %v559_v13 = vmin.f32 %v557_v3, %v1446_v1 }
  0xfc   : > { %v483_v4 = vpop.f32.mrf.mxu0 }
  0xfd   : > { %v547_v11 = vmin.f32 %v545_v63, %v540_v2  ;;  %v1450_v12 = vadd.f32 %v524_v60, %v483_v4 }
  0xff   : > { %v548_v14 = vmin.f32 %v546_v10, %v547_v11  ;;  %v560_v15 = vmin.f32 %v558_v5, %v1450_v12 }
 0x101   : > { %v549_v16 = vrot.slane %v548_v14, 4  ;;  %v561_v17 = vmin.f32 %v559_v13, %v560_v15 }
 0x103   : > { %v550_v18 = vmin.f32 %v548_v14, %v549_v16  ;;  %v562_v20 = vrot.slane %v561_v17, 4 }
 0x105   : > { %v551_v21 = vrot.slane %v550_v18, 2  ;;  %v563_v22 = vmin.f32 %v561_v17, %v562_v20  ;;  %v1241_v17 = vmov 1966171168  }
 0x107   : > { %v552_v23 = vmin.f32 %v550_v18, %v551_v21  ;;  %v564_v25 = vrot.slane %v563_v22, 2  ;;  %v657_v18 = vunpack.c.l.s4 %v1241_v17 }
 0x109   : > { %v553_v26 = vrot.slane %v552_v23, 1  ;;  %v565_v27 = vmin.f32 %v563_v22, %v564_v25  ;;  %v658_v22 = vunpack.c.0.s8 %v657_v18 }
 0x10b   : > { %v554_v28 = vmin.f32 %v552_v23, %v553_v26  ;;  %v566_v35 = vrot.slane %v565_v27, 1  ;;  %v1527_v26 = vsub.s32 %v658_v22, %v1455_v24 }
 0x10d   : > { %vm577_vm1 = vcmp.eq.f32.partialorder %v526_v45, %v554_v28  ;;  %vm579_vm2 = vcmp.eq.f32.partialorder %v528_v46, %v554_v28  ;;  %vm581_vm3 = vcmp.eq.f32.partialorder %v1421_v40, %v554_v28  ;;  %vm583_vm4 = vcmp.eq.f32.partialorder %v1423_v41, %v554_v28 }
 0x10e   : > { %vm585_vm5 = vcmp.eq.f32.partialorder %v534_v47, %v554_v28  ;;  %vm587_vm6 = vcmp.eq.f32.partialorder %v1429_v48, %v554_v28  ;;  %vm589_vm7 = vcmp.eq.f32.partialorder %v538_v57, %v554_v28  ;;  %v1468_v37 = vsel %vm577_vm1, %v1455_v24, 64 }
 0x10f   : > { %v1470_v38 = vsel %vm579_vm2, %v570_v29, 64  ;;  %v1472_v39 = vsel %vm581_vm3, %v571_v30, 64  ;;  %v1474_v44 = vsel %vm583_vm4, %v572_v31, 64  ;;  %vm591_vm8 = vcmp.eq.f32.partialorder %v540_v2, %v554_v28 }
 0x110   : > { %v1476_v45 = vsel %vm585_vm5, %v573_v32, 64  ;;  %vm609_vm9 = vcmp.lt.s32.totalorder %v1468_v37, %v1472_v39  ;;  %vm611_vm10 = vcmp.lt.s32.totalorder %v1470_v38, %v1474_v44  ;;  %v567_v40 = vmin.f32 %v565_v27, %v566_v35 }
 0x111   : > { %v1482_v41 = vsel %vm587_vm6, %v574_v33, 64  ;;  %v1484_v46 = vsel %vm589_vm7, %v575_v34, 64  ;;  %v610_v47 = vsel %vm609_vm9, %v1468_v37, %v1472_v39  ;;  %v612_v48 = vsel %vm611_vm10, %v1470_v38, %v1474_v44 }
 0x112   : > { %v1490_v51 = vsel %vm591_vm8, %v576_v36, 64  ;;  %vm613_vm11 = vcmp.lt.s32.totalorder %v610_v47, %v1476_v45  ;;  %vm615_vm12 = vcmp.lt.s32.totalorder %v612_v48, %v1482_v41  ;;  %vm578_vm13 = vcmp.eq.f32.partialorder %v1431_v49, %v567_v40 }
 0x113   : > { %v614_v53 = vsel %vm613_vm11, %v610_v47, %v1476_v45  ;;  %v616_v54 = vsel %vm615_vm12, %v612_v48, %v1482_v41  ;;  %vm580_vm14 = vcmp.eq.f32.partialorder %v1433_v50, %v567_v40  ;;  %vm582_vm15 = vcmp.eq.f32.partialorder %v1425_v42, %v567_v40 }
 0x114   : > { %vm617_vm0 = vcmp.lt.s32.totalorder %v614_v53, %v1484_v46  ;;  %vm619_vm1 = vcmp.lt.s32.totalorder %v616_v54, %v1490_v51  ;;  %vm584_vm2 = vcmp.eq.f32.partialorder %v1427_v43, %v567_v40  ;;  %vm586_vm3 = vcmp.eq.f32.partialorder %v1435_v52, %v567_v40 }
 0x115   : > { %v618_v55 = vsel %vm617_vm0, %v614_v53, %v1484_v46  ;;  %v620_v57 = vsel %vm619_vm1, %v616_v54, %v1490_v51  ;;  %v1506_v49 = vsel %vm578_vm13, %v1455_v24, 64  ;;  %v1508_v58 = vsel %vm580_vm14, %v570_v29, 64 }
 0x116   : > { %vm621_vm4 = vcmp.lt.s32.totalorder %v618_v55, %v620_v57  ;;  %v1510_v50 = vsel %vm582_vm15, %v571_v30, 64  ;;  %vm588_vm5 = vcmp.eq.f32.partialorder %v1439_v56, %v567_v40  ;;  %v1513_v59 = vsel %vm584_vm2, %v572_v31, 64  ;;  %v335_v31 = vld [vmem:[%s1621_s2 + $0x8] sm:$0xff] }
 0x117   : > { %v622_v42 = vsel %vm621_vm4, %v618_v55, %v620_v57  ;;  %vm590_vm6 = vcmp.eq.f32.partialorder %v1446_v1, %v567_v40  ;;  %vm632_vm7 = vcmp.lt.s32.totalorder %v1506_v49, %v1510_v50  ;;  %vm592_vm8 = vcmp.eq.f32.partialorder %v1450_v12, %v567_v40 }
 0x118   : > { %v623_v43 = vrot.slane %v622_v42, 4  ;;  %v602_v52 = vsel %vm586_vm3, %v573_v32, 64  ;;  %v633_v60 = vsel %vm632_vm7, %v1506_v49, %v1510_v50  ;;  %vm634_vm9 = vcmp.lt.s32.totalorder %v1508_v58, %v1513_v59 }
 0x119   : > { %v604_v61 = vsel %vm588_vm5, %v574_v33, 64  ;;  %v635_v56 = vsel %vm634_vm9, %v1508_v58, %v1513_v59  ;;  %vm636_vm11 = vcmp.lt.s32.totalorder %v633_v60, %v602_v52  ;;  %v606_v63 = vsel %vm590_vm6, %v575_v34, 64 }
 0x11a   : > { %vm624_vm10 = vcmp.lt.s32.totalorder %v622_v42, %v623_v43  ;;  %v637_v1 = vsel %vm636_vm11, %v633_v60, %v602_v52  ;;  %vm638_vm12 = vcmp.lt.s32.totalorder %v635_v56, %v604_v61  ;;  %v608_v3 = vsel %vm592_vm8, %v576_v36, 64 }
 0x11b   : > { %v625_v62 = vsel %vm624_vm10, %v622_v42, %v623_v43  ;;  %v639_v4 = vsel %vm638_vm12, %v635_v56, %v604_v61  ;;  %vm640_vm13 = vcmp.lt.s32.totalorder %v637_v1, %v606_v63  ;;  %v1242_v27 = vmov 1.0  }
 0x11c   : > { %v626_v2 = vrot.slane %v625_v62, 2  ;;  %v641_v5 = vsel %vm640_vm13, %v637_v1, %v606_v63  ;;  %vm642_vm14 = vcmp.lt.s32.totalorder %v639_v4, %v608_v3  ;;  %vm1538_vm11 = vcmp.lt.s32.totalorder %v568_v19, 256  ;;  %v334_v19 = vld [vmem:[%s1621_s2] sm:$0xff] }
 0x11d   : > { %v643_v10 = vsel %vm642_vm14, %v639_v4, %v608_v3 }
 0x11e   : > { %vm627_vm15 = vcmp.lt.s32.totalorder %v625_v62, %v626_v2  ;;  %vm644_vm0 = vcmp.lt.s32.totalorder %v641_v5, %v643_v10 }
 0x11f   : > { %v645_v11 = vsel %vm644_vm0, %v641_v5, %v643_v10  ;;  %v628_v12 = vsel %vm627_vm15, %v625_v62, %v626_v2 }
 0x120   : > { %v646_v13 = vrot.slane %v645_v11, 4  ;;  %v629_v14 = vrot.slane %v628_v12, 1 }
 0x122   : > { %vm647_vm1 = vcmp.lt.s32.totalorder %v645_v11, %v646_v13  ;;  %vm630_vm3 = vcmp.lt.s32.totalorder %v628_v12, %v629_v14 }
 0x123   : > { %v648_v15 = vsel %vm647_vm1, %v645_v11, %v646_v13  ;;  %v631_v23 = vsel %vm630_vm3, %v628_v12, %v629_v14 }
 0x124   : > { %v649_v16 = vrot.slane %v648_v15, 2  ;;  %vm689_vm6 = vcmp.eq.s32.totalorder %v1490_v51, %v631_v23  ;;  %vm687_vm8 = vcmp.eq.s32.totalorder %v1484_v46, %v631_v23  ;;  %vm685_vm10 = vcmp.eq.s32.totalorder %v1482_v41, %v631_v23 }
 0x125   : > { %vm683_vm13 = vcmp.eq.s32.totalorder %v1476_v45, %v631_v23  ;;  %vm681_vm15 = vcmp.eq.s32.totalorder %v1474_v44, %v631_v23  ;;  %vm679_vm1 = vcmp.eq.s32.totalorder %v1472_v39, %v631_v23  ;;  %vm677_vm3 = vcmp.eq.s32.totalorder %v1470_v38, %v631_v23 }
 0x126   : > { %vm650_vm2 = vcmp.lt.s32.totalorder %v648_v15, %v649_v16 }
 0x127   : > { %v651_v20 = vsel %vm650_vm2, %v648_v15, %v649_v16 }
 0x128   : > { %v652_v21 = vrot.slane %v651_v20, 1 }
 0x12a   : > { %vm653_vm4 = vcmp.lt.s32.totalorder %v651_v20, %v652_v21 }
 0x12b   : > { %v654_v25 = vsel %vm653_vm4, %v651_v20, %v652_v21 }
 0x12c   : > { %vm690_vm5 = vcmp.eq.s32.totalorder %v608_v3, %v654_v25  ;;  %vm688_vm7 = vcmp.eq.s32.totalorder %v606_v63, %v654_v25  ;;  %v655_v28 = vcombine.low %v631_v23, %v654_v25  ;;  %vm686_vm9 = vcmp.eq.s32.totalorder %v604_v61, %v654_v25 }
 0x12d   : > { %1074 = vmatprep.subr.msk.mxu1 %vm690_vm5, %v1242_v27  ;;  %vm684_vm12 = vcmp.eq.s32.totalorder %v602_v52, %v654_v25  ;;  %vm682_vm14 = vcmp.eq.s32.totalorder %v1513_v59, %v654_v25  ;;  %vm680_vm0 = vcmp.eq.s32.totalorder %v1510_v50, %v654_v25  ;;  %vm678_vm2 = vcmp.eq.s32.totalorder %v1508_v58, %v654_v25 }
 0x12e   : > { %1075 = vmatpush1.msk.msra.mxu1 %vm689_vm6, %v1242_v27  ;;  %v662_v29 = vrot.slane %v655_v28, %v1527_v26  ;;  %vm676_vm4 = vcmp.eq.s32.totalorder %v1506_v49, %v654_v25  ;;  %vm723_vm5 = vcmask 523264   ;;  %vm675_vm6 = vcmp.eq.s32.totalorder %v1468_v37, %v631_v23 }
 0x12f   : > { %1076 = vmatprep.subr.msk.mxu1 %vm688_vm7, %v1242_v27 }
 0x130   : > { %1077 = vmatpush1.msk.msra.mxu1 %vm687_vm8, %v1242_v27  ;;  %v669_v30 = vrot.slane %v662_v29, %v1527_v26 }
 0x131   : > { %1078 = vmatprep.subr.msk.mxu1 %vm686_vm9, %v1242_v27 }
 0x132   : > { %1079 = vmatpush1.msk.msra.mxu1 %vm685_vm10, %v1242_v27  ;;  %674 = vst.msk [vmem:[%s285_s13] sm:$0x3] %vm1538_vm11, %v669_v30 }
 0x133   : > { %1080 = vmatprep.subr.msk.mxu1 %vm684_vm12, %v1242_v27 }
 0x134   : > { %1081 = vmatpush1.msk.msra.mxu1 %vm683_vm13, %v1242_v27 }
 0x135   : > { %1082 = vmatprep.subr.msk.mxu1 %vm682_vm14, %v1242_v27 }
 0x136   : > { %1083 = vmatpush1.msk.msra.mxu1 %vm681_vm15, %v1242_v27 }
 0x137   : > { %1084 = vmatprep.subr.msk.mxu1 %vm680_vm0, %v1242_v27 }
 0x138   : > { %1085 = vmatpush1.msk.msra.mxu1 %vm679_vm1, %v1242_v27 }
 0x139   : > { %1086 = vmatprep.subr.msk.mxu1 %vm678_vm2, %v1242_v27 }
 0x13a   : > { %1087 = vmatpush1.msk.msra.mxu1 %vm677_vm3, %v1242_v27 }
 0x13b   : > { %1088 = vmatprep.subr.msk.mxu1 %vm676_vm4, %v1242_v27 }
 0x13c   : > { %1089 = vmatpush1.msk.msra.mxu1 %vm675_vm6, %v1242_v27 }
 0x13d   : > { %1090 = vmatmul.mubr.msk.f32.vlgmr.msra.gmra.mxu1 %vm723_vm5, %v334_v19 }
 0x13e   : > { %800 = vmatprep.mubr.f32.mxu1 %v1239_v0 }
 0x141   : > { %1091 = vmatmul.mubr.msk.f32.gmra.mxu1 %vm723_vm5, %v335_v31 }
 0x142   : > { %1174 = shalt.err (!%p1171_p5)
}
 0x143   : > { %s1175_s24 = scalar_lea.hbm %s888_s28, 32  ;;  %s1179_s18 = scalar_lea.hbm %s1624_s5, 64 }
 0x144   : > { %p1176_p6 = scmp.ne.s32.totalorder %s888_s28, %s1175_s24  ;;  %p1180_p10 = scmp.lt.s32.totalorder %s888_s28, %s1624_s5 }
 0x145   : > { %p1181_p11 = scmp.lt.s32.totalorder %s1179_s18, %s1175_s24 }
 0x146   : > { %p1177_p7 = pnand %p1176_p6, %p1319_p4 }
 0x147   : > { %p1182_p12 = por %p1181_p11, %p1180_p10 }
 0x148   : > { %p1178_p9 = pneg %p1177_p7 }
 0x14a   : > { %p1183_p13 = pnand %p1182_p12, %p1178_p9 }
 0x14c   : > { %1186 = shalt.err (!%p1183_p13)
}
 0x14d   : > { %1100 = dma.vmem_to_hbm [thread:$0]  (%p1319_p4), %s891_s30, 32, %s888_s28, %s862_s12  }
 0x14e   : > { %s1631_s16 = sshll.u32 %s1338_s11, 5  ;;  %s1049_s7 = sshll.u32 %s1338_s11, 1 }
 0x14f   : > { %s314_s15 = scalar_lea.vmem %s1623_s4, %s1631_s16  ;;  %s324_s12 = scalar_lea.vmem %s1625_s6, %s1049_s7 }
 0x1fd   : > { %v796_v0 = vpop.f32.mrf.mxu1 }
 0x1fe   : > { %807 = vst [vmem:[%s314_s15] sm:$0xff] %v796_v0  ;;  %v811_v33 = vsub.f32 %v796_v0, %v1365_v9 }
 0x1ff   : > { %v798_v32 = vpop.f32.mrf.mxu1 }
 0x200   : > { %808 = vst [vmem:[%s314_s15 + $0x8] sm:$0xff] %v798_v32  ;;  %v812_v35 = vsub.f32 %v798_v32, %v1362_v8  ;;  %v815_v38 = vmul.f32 %v811_v33, %v811_v33 }
 0x201   : > { %v802_v34 = vpop.f32.mrf.mxu1 }
 0x202   : > { %809 = vst [vmem:[%s314_s15 + $0x10] sm:$0xff] %v802_v34  ;;  %v813_v36 = vsub.f32 %v802_v34, %v1360_v7  ;;  %v816_v45 = vmul.f32 %v812_v35, %v812_v35 }
 0x203   : > { %v804_v37 = vpop.f32.mrf.mxu1 }
 0x204   : > { %v817_v39 = vmul.f32 %v813_v36, %v813_v36  ;;  %810 = vst [vmem:[%s314_s15 + $0x18] sm:$0xff] %v804_v37  ;;  %v814_v44 = vsub.f32 %v804_v37, %v1358_v6 }
 0x206   : > { %v819_v40 = vadd.f32 %v817_v39, %v815_v38  ;;  %v818_v41 = vmul.f32 %v814_v44, %v814_v44 }
 0x208   : > { %v820_v46 = vrot.slane %v819_v40, 4  ;;  %v826_v47 = vadd.f32 %v818_v41, %v816_v45 }
 0x20a   : > { %v821_v9 = vadd.f32 %v820_v46, %v819_v40  ;;  %v827_v48 = vrot.slane %v826_v47, 4 }
 0x20c   : > { %v822_v51 = vrot.slane %v821_v9, 2  ;;  %v828_v53 = vadd.f32 %v827_v48, %v826_v47 }
 0x20e   : > { %v823_v8 = vadd.f32 %v822_v51, %v821_v9  ;;  %v829_v54 = vrot.slane %v828_v53, 2 }
 0x210   : > { %v824_v55 = vrot.slane %v823_v8, 1  ;;  %v830_v7 = vadd.f32 %v829_v54, %v828_v53 }
 0x212   : > { %v831_v57 = vrot.slane %v830_v7, 1  ;;  %v825_v49 = vadd.f32 %v824_v55, %v823_v8 }
 0x214   : > { %v832_v58 = vadd.f32 %v831_v57, %v830_v7 }
 0x216   : > { %v835_v50 = vcombine.low %v825_v49, %v832_v58 }
 0x218   : > { %v842_v6 = vrot.slane %v835_v50, %v1527_v26 }
 0x21a   : > { %v849_v42 = vrot.slane %v842_v6, %v1527_v26 }
 0x21c   : > { %851 = vst.msk [vmem:[%s324_s12] sm:$0x3] %vm1538_vm11, %v849_v42 }
 0x21d PF: > { %p1106_p4 = scmp.ge.s32.totalorder %s1237_s26, 2  ;;  %s918_s17 = sand.u32 1, %s1217_s21  }
 0x21e   : > { %s919_s11 = scalar_lea.sflag [#allocation3], %s918_s17 }
 0x21f   : > { %p1103_p0 = pnand %p1106_p4, %p1326_p8 }
 0x221   : > { %p1104_p1 = pneg %p1103_p0 }
 0x223   : > { %1212 = dma.done.wait (%p1104_p1), %s919_s11, 32  }
 0x224   : > { %1214 = vsyncadd (%p1104_p1), %s919_s11, 4294967264  ;;  %s20_s26 = sadd.s32 1, %s1237_s26   ;;  %s1632_s21 = smov %s1221_s22 }
 0x225   : > { %p17_p2 = scmp.ge.s32.totalorder %s20_s26, 4   ;;  %s1633_s22 = smov %s1225_s23 }
 0x226   : > { %s1634_s23 = smov %s1332_s10  ;;  %s1635_s24 = smov %s1233_s25 }
 0x227   : > { %s1636_s25 = smov %s1638_s29  ;;  %19 = sbr.rel (!%p17_p2) target bundleno = 4 (0x4), region = 95 }
 0x22c   :  { %935 = vsyncpa [#allocation3], 1 }
 0x22d   :  { %937 = vsyncpa [#allocation3 + $0x1], 1 }

</bundles_post_ra>
